<compile_context>
chip_gen: v6e
topology: v6e:2x2x1
jax: 0.10.0
libtpu: 0.0.40
codegen_flags: <defaults>
</compile_context>

<pallas_src>
import functools
import math

import jax
import jax.numpy as jnp
from jax.experimental import pallas as pl
from jax.experimental.pallas import tpu as pltpu


def _mha_kernel(x_ref, wqkv_t_ref, bqkv_ref, wout_t_ref, bout_ref, o_ref, *,
                bt, seq, num_heads, head_dim, embed_dim, compute_dtype):
    # x_ref:      (bt*S, E)   token rows for bt packed batch elements
    # wqkv_t_ref: (E, 3E)     Wqkv.weight, pre-transposed (MXU RHS layout)
    # bqkv_ref:   (1, 3E)     Wqkv.bias (f32)
    # wout_t_ref: (E, E)      out_proj.weight, pre-transposed
    # bout_ref:   (1, E)      out_proj.bias (f32)
    # o_ref:      (bt*S, E)
    S, H, D, E = seq, num_heads, head_dim, embed_dim
    scale = 1.0 / math.sqrt(D)

    x = x_ref[...]               # already in compute dtype (wrapper casts)
    wqkv_t = wqkv_t_ref[...]
    wout_t = wout_t_ref[...]

    # Fused QKV projection: one big MXU matmul, f32 accumulation + f32 bias.
    qkv = jnp.dot(x, wqkv_t, preferred_element_type=jnp.float32) + bqkv_ref[...]
    # qkv columns are laid out as (three, h, d): [0:E) = q, [E:2E) = k, [2E:3E) = v.

    # Per-head attention, batched over the packed batch dimension; the head
    # concat is folded into the output projection via accumulation.
    acc = jnp.zeros((bt * S, E), jnp.float32)
    for h in range(H):
        q = qkv[:, h * D:(h + 1) * D].reshape(bt, S, D).astype(compute_dtype)
        k = qkv[:, E + h * D:E + (h + 1) * D].reshape(bt, S, D).astype(compute_dtype)
        v = qkv[:, 2 * E + h * D:2 * E + (h + 1) * D].reshape(bt, S, D).astype(compute_dtype)

        # scores: (bt, S, S), f32
        scores = jnp.einsum("bqd,bkd->bqk", q, k,
                            preferred_element_type=jnp.float32) * scale
        m = jnp.max(scores, axis=-1, keepdims=True)
        p = jnp.exp(scores - m)
        denom = jnp.sum(p, axis=-1, keepdims=True)
        attn = p * pl.reciprocal(denom, approx=True)

        # out_h: (bt, S, D), f32 accumulation on the MXU
        out_h = jnp.einsum("bqk,bkd->bqd", attn.astype(compute_dtype), v,
                           preferred_element_type=jnp.float32)

        # Fold the head-concat into the output projection:
        #   final += out_h @ Wout_T[h*D:(h+1)*D, :]
        acc = acc + jnp.dot(out_h.reshape(bt * S, D).astype(compute_dtype),
                            wout_t[h * D:(h + 1) * D, :],
                            preferred_element_type=jnp.float32)

    final = acc + bout_ref[...]                 # (bt*S, E), f32
    o_ref[...] = final.astype(o_ref.dtype)


def _pick_batch_tile(B, S):
    """Largest batch tile that (a) divides B, (b) satisfies the TPU
    second-minor blocking rule (tile == B or tile % 8 == 0), (c) keeps the
    per-step token-row count around <= 256, and (d) leaves >= 2 grid steps when
    possible so v7x's two TensorCores both get work."""
    candidates = [d for d in range(1, B + 1)
                  if B % d == 0 and (d == B or d % 8 == 0)]
    good = [d for d in candidates if d * S <= 256]
    if not good:
        return min(candidates)
    bt = max(good)
    smaller = [d for d in good if d < B]
    if bt == B and smaller:
        bt = max(smaller)       # prefer >= 2 grid steps when it costs little
    return bt


def mha_forward(x, w_qkv, b_qkv, w_out, b_out, num_heads, *,
                block_batch=None, compute_dtype=None):
    """x: (B, S, E); w_qkv: (3E, E); b_qkv: (3E,); w_out: (E, E); b_out: (E,)."""
    B, S, E = x.shape
    assert E % num_heads == 0
    D = E // num_heads
    if compute_dtype is None:
        compute_dtype = x.dtype

    bt = block_batch if block_batch is not None else _pick_batch_tile(B, S)
    assert B % bt == 0 and (bt == B or bt % 8 == 0), "invalid batch tile"
    grid = (B // bt,)

    # One-time wrapper-side prep: pre-transpose weights into MXU RHS layout,
    # flatten x to (B*S, E) token rows, optionally cast MXU operands (bf16 on
    # v6e/v7x); biases stay f32 and are added to the f32 accumulators.
    w_qkv_t = jnp.asarray(w_qkv).T.astype(compute_dtype)        # (E, 3E)
    w_out_t = jnp.asarray(w_out).T.astype(compute_dtype)        # (E, E)
    b_qkv2 = jnp.asarray(b_qkv).reshape(1, 3 * E).astype(jnp.float32)
    b_out2 = jnp.asarray(b_out).reshape(1, E).astype(jnp.float32)
    x_rows = x.reshape(B * S, E).astype(compute_dtype)          # (B*S, E)

    kernel = functools.partial(
        _mha_kernel, bt=bt, seq=S, num_heads=num_heads, head_dim=D,
        embed_dim=E, compute_dtype=compute_dtype)

    out_rows = pl.pallas_call(
        kernel,
        out_shape=jax.ShapeDtypeStruct((B * S, E), x.dtype),
        grid=grid,
        in_specs=[
            pl.BlockSpec((bt * S, E), lambda b: (b, 0)),    # packed token rows
            pl.BlockSpec((E, 3 * E), lambda b: (0, 0)),     # Wqkv^T (resident)
            pl.BlockSpec((1, 3 * E), lambda b: (0, 0)),     # b_qkv
            pl.BlockSpec((E, E), lambda b: (0, 0)),         # Wout^T (resident)
            pl.BlockSpec((1, E), lambda b: (0, 0)),         # b_out
        ],
        out_specs=pl.BlockSpec((bt * S, E), lambda b: (b, 0)),
        compiler_params=pltpu.CompilerParams(
            dimension_semantics=("parallel",),
            vmem_limit_bytes=32 * 1024 * 1024,
        ),
    )(x_rows, w_qkv_t, b_qkv2, w_out_t, b_out2)

    return out_rows.reshape(B, S, E)


def mha_reference(x, w_qkv, b_qkv, w_out, b_out, num_heads):
    """Pure-JAX reference matching the PyTorch forward."""
    B, S, E = x.shape
    D = E // num_heads
    qkv = jnp.einsum("bse,fe->bsf", x, w_qkv) + b_qkv          # (B, S, 3E)
    qkv = qkv.reshape(B, S, 3, num_heads, D)
    q, k, v = [jnp.transpose(qkv[:, :, i], (0, 2, 1, 3)) for i in range(3)]
    scores = jnp.einsum("bhqd,bhkd->bhqk", q, k) / math.sqrt(D)
    attn = jax.nn.softmax(scores, axis=-1)
    out = jnp.einsum("bhqk,bhkd->bhqd", attn, v)               # (B, H, S, D)
    out = jnp.transpose(out, (0, 2, 1, 3)).reshape(B, S, E)
    return jnp.einsum("bse,fe->bsf", out, w_out) + b_out


if __name__ == "__main__":
    # Module config: embed_dim=32, num_heads=4 -> head_dim=8 (divisible by 8, <=128)
    B, S, E, H = 2, 8, 32, 4

    key = jax.random.PRNGKey(0)
    kx, kw1, kb1, kw2, kb2, kx2 = jax.random.split(key, 6)

    x = jax.random.normal(kx, (B, S, E), dtype=jnp.float32)

    lim1 = 1.0 / math.sqrt(E)
    w_qkv = jax.random.uniform(kw1, (3 * E, E), minval=-lim1, maxval=lim1, dtype=jnp.float32)
    b_qkv = jax.random.uniform(kb1, (3 * E,), minval=-lim1, maxval=lim1, dtype=jnp.float32)
    w_out = jax.random.uniform(kw2, (E, E), minval=-lim1, maxval=lim1, dtype=jnp.float32)
    b_out = jax.random.uniform(kb2, (E,), minval=-lim1, maxval=lim1, dtype=jnp.float32)

    # --- small config (B=2): single grid step, f32 compute ---
    out = mha_forward(x, w_qkv, b_qkv, w_out, b_out, H)
    out = jax.block_until_ready(out)
    ref = mha_reference(x, w_qkv, b_qkv, w_out, b_out, H)
    assert out.shape == (B, S, E)
    assert jnp.allclose(out, ref, atol=5e-3, rtol=5e-3), "f32 mismatch vs JAX reference"

    # --- bigger batch: exercises batch-tile packing (Bt=32 -> 256 token rows
    # per step, 2 parallel grid steps) and the bf16 MXU-operand path ---
    B2 = 64
    x_big = jax.random.normal(kx2, (B2, S, E), dtype=jnp.float32)
    out_big = mha_forward(x_big, w_qkv, b_qkv, w_out, b_out, H,
                          compute_dtype=jnp.bfloat16)
    out_big = jax.block_until_ready(out_big)
    ref_big = mha_reference(x_big, w_qkv, b_qkv, w_out, b_out, H)
    assert out_big.shape == (B2, S, E)
    assert jnp.allclose(out_big, ref_big, atol=1e-1, rtol=1e-1), "bf16 mismatch vs JAX reference"

    print("KERNEL_OK")
</pallas_src>

<mosaic_0001>
module attributes {stable_mosaic.version = 11 : i64} {
  func.func @_mha_kernel(%arg0: i32, %arg1: memref<16x32xf32, #tpu.memory_space<vmem>>, %arg2: memref<32x96xf32, #tpu.memory_space<vmem>>, %arg3: memref<1x96xf32, #tpu.memory_space<vmem>>, %arg4: memref<32x32xf32, #tpu.memory_space<vmem>>, %arg5: memref<1x32xf32, #tpu.memory_space<vmem>>, %arg6: memref<16x32xf32, #tpu.memory_space<vmem>>) attributes {dimension_semantics = [#tpu.dimension_semantics<parallel>], iteration_bounds = array<i64: 1>, scalar_prefetch = 0 : i64, scratch_operands = 0 : i64, tpu.core_type = #tpu.core_type<tc>, window_params = [{transform_indices = @transform_0, window_bounds = array<i64: 16, 32>}, {pipeline_mode = #tpu.pipeline_mode<synchronous>, transform_indices = @transform_1, window_bounds = array<i64: 32, 96>}, {pipeline_mode = #tpu.pipeline_mode<synchronous>, transform_indices = @transform_2, window_bounds = array<i64: 1, 96>}, {pipeline_mode = #tpu.pipeline_mode<synchronous>, transform_indices = @transform_3, window_bounds = array<i64: 32, 32>}, {pipeline_mode = #tpu.pipeline_mode<synchronous>, transform_indices = @transform_4, window_bounds = array<i64: 1, 32>}, {transform_indices = @transform_5, window_bounds = array<i64: 16, 32>}]} {
    %c0 = arith.constant 0 : index
    %c0_0 = arith.constant 0 : index
    %0 = vector.load %arg1[%c0, %c0_0] : memref<16x32xf32, #tpu.memory_space<vmem>>, vector<16x32xf32>
    %c0_1 = arith.constant 0 : index
    %c0_2 = arith.constant 0 : index
    %1 = vector.load %arg2[%c0_1, %c0_2] : memref<32x96xf32, #tpu.memory_space<vmem>>, vector<32x96xf32>
    %c0_3 = arith.constant 0 : index
    %c0_4 = arith.constant 0 : index
    %2 = vector.load %arg4[%c0_3, %c0_4] : memref<32x32xf32, #tpu.memory_space<vmem>>, vector<32x32xf32>
    %cst = arith.constant dense<0.000000e+00> : vector<16x96xf32>
    %3 = tpu.matmul %0, %1, %cst {dimension_numbers = #tpu.dot_dimension_numbers<[1], [0], [0], [1], [0, 0, 1, 1], [], []>} : vector<16x32xf32>, vector<32x96xf32>, vector<16x96xf32> -> vector<16x96xf32>
    %c0_5 = arith.constant 0 : index
    %c0_6 = arith.constant 0 : index
    %4 = vector.load %arg3[%c0_5, %c0_6] : memref<1x96xf32, #tpu.memory_space<vmem>>, vector<1x96xf32>
    %5 = vector.broadcast %4 : vector<1x96xf32> to vector<16x96xf32>
    %6 = arith.addf %3, %5 : vector<16x96xf32>
    %cst_7 = arith.constant 0.000000e+00 : f32
    %7 = vector.broadcast %cst_7 : f32 to vector<16x32xf32>
    %8 = vector.extract_strided_slice %6 {offsets = [0, 0], sizes = [16, 8], strides = [1, 1]} : vector<16x96xf32> to vector<16x8xf32>
    %9 = vector.shape_cast %8 : vector<16x8xf32> to vector<2x8x8xf32>
    %10 = vector.extract_strided_slice %6 {offsets = [0, 32], sizes = [16, 8], strides = [1, 1]} : vector<16x96xf32> to vector<16x8xf32>
    %11 = vector.shape_cast %10 : vector<16x8xf32> to vector<2x8x8xf32>
    %12 = vector.extract_strided_slice %6 {offsets = [0, 64], sizes = [16, 8], strides = [1, 1]} : vector<16x96xf32> to vector<16x8xf32>
    %13 = vector.shape_cast %12 : vector<16x8xf32> to vector<2x8x8xf32>
    "tpu.trace_start"() <{level = 10 : i32, message = "bqd,bkd->bqk"}> : () -> ()
    %cst_8 = arith.constant dense<0.000000e+00> : vector<2x8x8xf32>
    %14 = tpu.matmul %9, %11, %cst_8 {dimension_numbers = #tpu.dot_dimension_numbers<[2], [2], [1], [1], [0, 0, 0, 1, 1, 1], [0], [0]>} : vector<2x8x8xf32>, vector<2x8x8xf32>, vector<2x8x8xf32> -> vector<2x8x8xf32>
    "tpu.trace_stop"() : () -> ()
    %cst_9 = arith.constant 0.353553385 : f32
    %15 = vector.broadcast %cst_9 : f32 to vector<2x8x8xf32>
    %16 = arith.mulf %14, %15 : vector<2x8x8xf32>
    %cst_10 = arith.constant dense<0xFF800000> : vector<2x8xf32>
    %17 = vector.multi_reduction <maximumf>, %16, %cst_10 [2] : vector<2x8x8xf32> to vector<2x8xf32>
    %18 = vector.shape_cast %17 : vector<2x8xf32> to vector<2x8x1xf32>
    %19 = vector.broadcast %18 : vector<2x8x1xf32> to vector<2x8x8xf32>
    %20 = arith.subf %16, %19 : vector<2x8x8xf32>
    %21 = math.exp %20 : vector<2x8x8xf32>
    %cst_11 = arith.constant dense<0.000000e+00> : vector<2x8xf32>
    %22 = vector.multi_reduction <add>, %21, %cst_11 [2] : vector<2x8x8xf32> to vector<2x8xf32>
    %23 = vector.shape_cast %22 : vector<2x8xf32> to vector<2x8x1xf32>
    %24 = tpu.reciprocal %23 {approx = true} : vector<2x8x1xf32> -> vector<2x8x1xf32>
    %25 = vector.broadcast %24 : vector<2x8x1xf32> to vector<2x8x8xf32>
    %26 = arith.mulf %21, %25 : vector<2x8x8xf32>
    "tpu.trace_start"() <{level = 10 : i32, message = "bqk,bkd->bqd"}> : () -> ()
    %cst_12 = arith.constant dense<0.000000e+00> : vector<2x8x8xf32>
    %27 = tpu.matmul %26, %13, %cst_12 {dimension_numbers = #tpu.dot_dimension_numbers<[2], [1], [1], [2], [0, 0, 0, 1, 1, 2], [0], [0]>} : vector<2x8x8xf32>, vector<2x8x8xf32>, vector<2x8x8xf32> -> vector<2x8x8xf32>
    "tpu.trace_stop"() : () -> ()
    %28 = vector.shape_cast %27 : vector<2x8x8xf32> to vector<16x8xf32>
    %29 = vector.extract_strided_slice %2 {offsets = [0, 0], sizes = [8, 32], strides = [1, 1]} : vector<32x32xf32> to vector<8x32xf32>
    %cst_13 = arith.constant dense<0.000000e+00> : vector<16x32xf32>
    %30 = tpu.matmul %28, %29, %cst_13 {dimension_numbers = #tpu.dot_dimension_numbers<[1], [0], [0], [1], [0, 0, 1, 1], [], []>} : vector<16x8xf32>, vector<8x32xf32>, vector<16x32xf32> -> vector<16x32xf32>
    %31 = arith.addf %7, %30 : vector<16x32xf32>
    %32 = vector.extract_strided_slice %6 {offsets = [0, 8], sizes = [16, 8], strides = [1, 1]} : vector<16x96xf32> to vector<16x8xf32>
    %33 = vector.shape_cast %32 : vector<16x8xf32> to vector<2x8x8xf32>
    %34 = vector.extract_strided_slice %6 {offsets = [0, 40], sizes = [16, 8], strides = [1, 1]} : vector<16x96xf32> to vector<16x8xf32>
    %35 = vector.shape_cast %34 : vector<16x8xf32> to vector<2x8x8xf32>
    %36 = vector.extract_strided_slice %6 {offsets = [0, 72], sizes = [16, 8], strides = [1, 1]} : vector<16x96xf32> to vector<16x8xf32>
    %37 = vector.shape_cast %36 : vector<16x8xf32> to vector<2x8x8xf32>
    "tpu.trace_start"() <{level = 10 : i32, message = "bqd,bkd->bqk"}> : () -> ()
    %cst_14 = arith.constant dense<0.000000e+00> : vector<2x8x8xf32>
    %38 = tpu.matmul %33, %35, %cst_14 {dimension_numbers = #tpu.dot_dimension_numbers<[2], [2], [1], [1], [0, 0, 0, 1, 1, 1], [0], [0]>} : vector<2x8x8xf32>, vector<2x8x8xf32>, vector<2x8x8xf32> -> vector<2x8x8xf32>
    "tpu.trace_stop"() : () -> ()
    %cst_15 = arith.constant 0.353553385 : f32
    %39 = vector.broadcast %cst_15 : f32 to vector<2x8x8xf32>
    %40 = arith.mulf %38, %39 : vector<2x8x8xf32>
    %cst_16 = arith.constant dense<0xFF800000> : vector<2x8xf32>
    %41 = vector.multi_reduction <maximumf>, %40, %cst_16 [2] : vector<2x8x8xf32> to vector<2x8xf32>
    %42 = vector.shape_cast %41 : vector<2x8xf32> to vector<2x8x1xf32>
    %43 = vector.broadcast %42 : vector<2x8x1xf32> to vector<2x8x8xf32>
    %44 = arith.subf %40, %43 : vector<2x8x8xf32>
    %45 = math.exp %44 : vector<2x8x8xf32>
    %cst_17 = arith.constant dense<0.000000e+00> : vector<2x8xf32>
    %46 = vector.multi_reduction <add>, %45, %cst_17 [2] : vector<2x8x8xf32> to vector<2x8xf32>
    %47 = vector.shape_cast %46 : vector<2x8xf32> to vector<2x8x1xf32>
    %48 = tpu.reciprocal %47 {approx = true} : vector<2x8x1xf32> -> vector<2x8x1xf32>
    %49 = vector.broadcast %48 : vector<2x8x1xf32> to vector<2x8x8xf32>
    %50 = arith.mulf %45, %49 : vector<2x8x8xf32>
    "tpu.trace_start"() <{level = 10 : i32, message = "bqk,bkd->bqd"}> : () -> ()
    %cst_18 = arith.constant dense<0.000000e+00> : vector<2x8x8xf32>
    %51 = tpu.matmul %50, %37, %cst_18 {dimension_numbers = #tpu.dot_dimension_numbers<[2], [1], [1], [2], [0, 0, 0, 1, 1, 2], [0], [0]>} : vector<2x8x8xf32>, vector<2x8x8xf32>, vector<2x8x8xf32> -> vector<2x8x8xf32>
    "tpu.trace_stop"() : () -> ()
    %52 = vector.shape_cast %51 : vector<2x8x8xf32> to vector<16x8xf32>
    %53 = vector.extract_strided_slice %2 {offsets = [8, 0], sizes = [8, 32], strides = [1, 1]} : vector<32x32xf32> to vector<8x32xf32>
    %cst_19 = arith.constant dense<0.000000e+00> : vector<16x32xf32>
    %54 = tpu.matmul %52, %53, %cst_19 {dimension_numbers = #tpu.dot_dimension_numbers<[1], [0], [0], [1], [0, 0, 1, 1], [], []>} : vector<16x8xf32>, vector<8x32xf32>, vector<16x32xf32> -> vector<16x32xf32>
    %55 = arith.addf %31, %54 : vector<16x32xf32>
    %56 = vector.extract_strided_slice %6 {offsets = [0, 16], sizes = [16, 8], strides = [1, 1]} : vector<16x96xf32> to vector<16x8xf32>
    %57 = vector.shape_cast %56 : vector<16x8xf32> to vector<2x8x8xf32>
    %58 = vector.extract_strided_slice %6 {offsets = [0, 48], sizes = [16, 8], strides = [1, 1]} : vector<16x96xf32> to vector<16x8xf32>
    %59 = vector.shape_cast %58 : vector<16x8xf32> to vector<2x8x8xf32>
    %60 = vector.extract_strided_slice %6 {offsets = [0, 80], sizes = [16, 8], strides = [1, 1]} : vector<16x96xf32> to vector<16x8xf32>
    %61 = vector.shape_cast %60 : vector<16x8xf32> to vector<2x8x8xf32>
    "tpu.trace_start"() <{level = 10 : i32, message = "bqd,bkd->bqk"}> : () -> ()
    %cst_20 = arith.constant dense<0.000000e+00> : vector<2x8x8xf32>
    %62 = tpu.matmul %57, %59, %cst_20 {dimension_numbers = #tpu.dot_dimension_numbers<[2], [2], [1], [1], [0, 0, 0, 1, 1, 1], [0], [0]>} : vector<2x8x8xf32>, vector<2x8x8xf32>, vector<2x8x8xf32> -> vector<2x8x8xf32>
    "tpu.trace_stop"() : () -> ()
    %cst_21 = arith.constant 0.353553385 : f32
    %63 = vector.broadcast %cst_21 : f32 to vector<2x8x8xf32>
    %64 = arith.mulf %62, %63 : vector<2x8x8xf32>
    %cst_22 = arith.constant dense<0xFF800000> : vector<2x8xf32>
    %65 = vector.multi_reduction <maximumf>, %64, %cst_22 [2] : vector<2x8x8xf32> to vector<2x8xf32>
    %66 = vector.shape_cast %65 : vector<2x8xf32> to vector<2x8x1xf32>
    %67 = vector.broadcast %66 : vector<2x8x1xf32> to vector<2x8x8xf32>
    %68 = arith.subf %64, %67 : vector<2x8x8xf32>
    %69 = math.exp %68 : vector<2x8x8xf32>
    %cst_23 = arith.constant dense<0.000000e+00> : vector<2x8xf32>
    %70 = vector.multi_reduction <add>, %69, %cst_23 [2] : vector<2x8x8xf32> to vector<2x8xf32>
    %71 = vector.shape_cast %70 : vector<2x8xf32> to vector<2x8x1xf32>
    %72 = tpu.reciprocal %71 {approx = true} : vector<2x8x1xf32> -> vector<2x8x1xf32>
    %73 = vector.broadcast %72 : vector<2x8x1xf32> to vector<2x8x8xf32>
    %74 = arith.mulf %69, %73 : vector<2x8x8xf32>
    "tpu.trace_start"() <{level = 10 : i32, message = "bqk,bkd->bqd"}> : () -> ()
    %cst_24 = arith.constant dense<0.000000e+00> : vector<2x8x8xf32>
    %75 = tpu.matmul %74, %61, %cst_24 {dimension_numbers = #tpu.dot_dimension_numbers<[2], [1], [1], [2], [0, 0, 0, 1, 1, 2], [0], [0]>} : vector<2x8x8xf32>, vector<2x8x8xf32>, vector<2x8x8xf32> -> vector<2x8x8xf32>
    "tpu.trace_stop"() : () -> ()
    %76 = vector.shape_cast %75 : vector<2x8x8xf32> to vector<16x8xf32>
    %77 = vector.extract_strided_slice %2 {offsets = [16, 0], sizes = [8, 32], strides = [1, 1]} : vector<32x32xf32> to vector<8x32xf32>
    %cst_25 = arith.constant dense<0.000000e+00> : vector<16x32xf32>
    %78 = tpu.matmul %76, %77, %cst_25 {dimension_numbers = #tpu.dot_dimension_numbers<[1], [0], [0], [1], [0, 0, 1, 1], [], []>} : vector<16x8xf32>, vector<8x32xf32>, vector<16x32xf32> -> vector<16x32xf32>
    %79 = arith.addf %55, %78 : vector<16x32xf32>
    %80 = vector.extract_strided_slice %6 {offsets = [0, 24], sizes = [16, 8], strides = [1, 1]} : vector<16x96xf32> to vector<16x8xf32>
    %81 = vector.shape_cast %80 : vector<16x8xf32> to vector<2x8x8xf32>
    %82 = vector.extract_strided_slice %6 {offsets = [0, 56], sizes = [16, 8], strides = [1, 1]} : vector<16x96xf32> to vector<16x8xf32>
    %83 = vector.shape_cast %82 : vector<16x8xf32> to vector<2x8x8xf32>
    %84 = vector.extract_strided_slice %6 {offsets = [0, 88], sizes = [16, 8], strides = [1, 1]} : vector<16x96xf32> to vector<16x8xf32>
    %85 = vector.shape_cast %84 : vector<16x8xf32> to vector<2x8x8xf32>
    "tpu.trace_start"() <{level = 10 : i32, message = "bqd,bkd->bqk"}> : () -> ()
    %cst_26 = arith.constant dense<0.000000e+00> : vector<2x8x8xf32>
    %86 = tpu.matmul %81, %83, %cst_26 {dimension_numbers = #tpu.dot_dimension_numbers<[2], [2], [1], [1], [0, 0, 0, 1, 1, 1], [0], [0]>} : vector<2x8x8xf32>, vector<2x8x8xf32>, vector<2x8x8xf32> -> vector<2x8x8xf32>
    "tpu.trace_stop"() : () -> ()
    %cst_27 = arith.constant 0.353553385 : f32
    %87 = vector.broadcast %cst_27 : f32 to vector<2x8x8xf32>
    %88 = arith.mulf %86, %87 : vector<2x8x8xf32>
    %cst_28 = arith.constant dense<0xFF800000> : vector<2x8xf32>
    %89 = vector.multi_reduction <maximumf>, %88, %cst_28 [2] : vector<2x8x8xf32> to vector<2x8xf32>
    %90 = vector.shape_cast %89 : vector<2x8xf32> to vector<2x8x1xf32>
    %91 = vector.broadcast %90 : vector<2x8x1xf32> to vector<2x8x8xf32>
    %92 = arith.subf %88, %91 : vector<2x8x8xf32>
    %93 = math.exp %92 : vector<2x8x8xf32>
    %cst_29 = arith.constant dense<0.000000e+00> : vector<2x8xf32>
    %94 = vector.multi_reduction <add>, %93, %cst_29 [2] : vector<2x8x8xf32> to vector<2x8xf32>
    %95 = vector.shape_cast %94 : vector<2x8xf32> to vector<2x8x1xf32>
    %96 = tpu.reciprocal %95 {approx = true} : vector<2x8x1xf32> -> vector<2x8x1xf32>
    %97 = vector.broadcast %96 : vector<2x8x1xf32> to vector<2x8x8xf32>
    %98 = arith.mulf %93, %97 : vector<2x8x8xf32>
    "tpu.trace_start"() <{level = 10 : i32, message = "bqk,bkd->bqd"}> : () -> ()
    %cst_30 = arith.constant dense<0.000000e+00> : vector<2x8x8xf32>
    %99 = tpu.matmul %98, %85, %cst_30 {dimension_numbers = #tpu.dot_dimension_numbers<[2], [1], [1], [2], [0, 0, 0, 1, 1, 2], [0], [0]>} : vector<2x8x8xf32>, vector<2x8x8xf32>, vector<2x8x8xf32> -> vector<2x8x8xf32>
    "tpu.trace_stop"() : () -> ()
    %100 = vector.shape_cast %99 : vector<2x8x8xf32> to vector<16x8xf32>
    %101 = vector.extract_strided_slice %2 {offsets = [24, 0], sizes = [8, 32], strides = [1, 1]} : vector<32x32xf32> to vector<8x32xf32>
    %cst_31 = arith.constant dense<0.000000e+00> : vector<16x32xf32>
    %102 = tpu.matmul %100, %101, %cst_31 {dimension_numbers = #tpu.dot_dimension_numbers<[1], [0], [0], [1], [0, 0, 1, 1], [], []>} : vector<16x8xf32>, vector<8x32xf32>, vector<16x32xf32> -> vector<16x32xf32>
    %103 = arith.addf %79, %102 : vector<16x32xf32>
    %c0_32 = arith.constant 0 : index
    %c0_33 = arith.constant 0 : index
    %104 = vector.load %arg5[%c0_32, %c0_33] : memref<1x32xf32, #tpu.memory_space<vmem>>, vector<1x32xf32>
    %105 = vector.broadcast %104 : vector<1x32xf32> to vector<16x32xf32>
    %106 = arith.addf %103, %105 : vector<16x32xf32>
    %c0_34 = arith.constant 0 : index
    %c0_35 = arith.constant 0 : index
    %107 = vector.load %arg6[%c0_34, %c0_35] : memref<16x32xf32, #tpu.memory_space<vmem>>, vector<16x32xf32>
    tpu.vector_store %arg6[%c0_34, %c0_35], %106 {strides = array<i32>} : memref<16x32xf32, #tpu.memory_space<vmem>>, vector<16x32xf32>,
    return
  }
  func.func @transform_0(%arg0: i32) -> (i32, i32) {
    %c0_i32 = arith.constant 0 : i32
    %c0_i32_0 = arith.constant 0 : i32
    return %arg0, %c0_i32 : i32, i32
  }
  func.func @transform_1(%arg0: i32) -> (i32, i32) {
    %c0_i32 = arith.constant 0 : i32
    %c0_i32_0 = arith.constant 0 : i32
    %c0_i32_1 = arith.constant 0 : i32
    return %c0_i32, %c0_i32_0 : i32, i32
  }
  func.func @transform_2(%arg0: i32) -> (i32, i32) {
    %c0_i32 = arith.constant 0 : i32
    %c0_i32_0 = arith.constant 0 : i32
    %c0_i32_1 = arith.constant 0 : i32
    return %c0_i32, %c0_i32_0 : i32, i32
  }
  func.func @transform_3(%arg0: i32) -> (i32, i32) {
    %c0_i32 = arith.constant 0 : i32
    %c0_i32_0 = arith.constant 0 : i32
    %c0_i32_1 = arith.constant 0 : i32
    return %c0_i32, %c0_i32_0 : i32, i32
  }
  func.func @transform_4(%arg0: i32) -> (i32, i32) {
    %c0_i32 = arith.constant 0 : i32
    %c0_i32_0 = arith.constant 0 : i32
    %c0_i32_1 = arith.constant 0 : i32
    return %c0_i32, %c0_i32_0 : i32, i32
  }
  func.func @transform_5(%arg0: i32) -> (i32, i32) {
    %c0_i32 = arith.constant 0 : i32
    %c0_i32_0 = arith.constant 0 : i32
    return %arg0, %c0_i32 : i32, i32
  }
}

</mosaic_0001>

<bundles_post_ra>
// kernel: tpu_custom_call.1
= control target key start
LH: loop header
LB: loop body
LE: loop exit
PB: predicated region body
PF: predicated region fallthrough
CT: control target
= control target key end

     0   :  { %10 = vsyncpa [#allocation3], 0  ;;  %s2398_s0 = inlined_call_operand.hbm [shape: f32[16,32], index: 0, kind: input, shape index: {}]   ;;  %s2399_s1 = inlined_call_operand.hbm [shape: f32[32,96], index: 1, kind: input, shape index: {}]   ;;  %s2400_s2 = inlined_call_operand.vmem [shape: f32[1,96], index: 2, kind: input, shape index: {}]   ;;  %s2401_s3 = inlined_call_operand.hbm [shape: f32[32,32], index: 3, kind: input, shape index: {}]   ;;  %s2402_s4 = inlined_call_operand.vmem [shape: f32[1,32], index: 4, kind: input, shape index: {}]   ;;  %s2403_s5 = inlined_call_operand.hbm [shape: f32[16,32], index: 5, kind: output, shape index: {}]  }
   0x1   :  { %11 = vsyncpa [#allocation6], 0 }
   0x2   :  { %12 = vsyncpa [#allocation4], 0  ;;  %s2179_s18 = smov [#allocation5]   ;;  %s2180_s20 = smov [#allocation2]  }
   0x3   :  { %s30_s19 = sshll.u32 %s2179_s18, 4  ;;  %s18_s21 = sshll.u32 %s2180_s20, 4  ;;  %s31_s19 = int_to_ptr.vmem [resolvable:$true] %s30_s19  ;;  %s19_s21 = int_to_ptr.vmem [resolvable:$true] %s18_s21 }
   0x4   :  { %s2101_s22 = scalar_lea.vmem %s31_s19, 512  ;;  %p2106_p1 = scmp.lt.s32.totalorder %s31_s19, %s31_s19 }
   0x5   :  { %p2102_p0 = scmp.ne.s32.totalorder %s31_s19, %s2101_s22  ;;  %p2107_p2 = scmp.lt.s32.totalorder %s2101_s22, %s2101_s22 }
   0x7   :  { %p2108_p3 = por %p2107_p2, %p2106_p1 }
   0x9   :  { %p2109_p4 = pnand %p2108_p3, %p2102_p0 }
   0xb   :  { %2112 = shalt.err (!%p2109_p4)
}
   0xc   :  { %s2181_s23 = smov 128   ;;  %s2182_s24 = smov 8  }
   0xd   :  { %36 = dma.hbm_to_vmem [thread:$0]  %s2399_s1, 512, %s31_s19, [#allocation6], %s2181_s23, %s2181_s23, %s2182_s24  }
   0xe   :  { %s2121_s27 = scalar_lea.vmem %s19_s21, 256  ;;  %p2126_p6 = scmp.lt.s32.totalorder %s19_s21, %s19_s21 }
   0xf   :  { %p2122_p5 = scmp.ne.s32.totalorder %s19_s21, %s2121_s27  ;;  %p2127_p7 = scmp.lt.s32.totalorder %s2121_s27, %s2121_s27 }
  0x11   :  { %p2128_p8 = por %p2127_p7, %p2126_p6 }
  0x13   :  { %p2129_p9 = pnand %p2128_p8, %p2122_p5 }
  0x15   :  { %2132 = shalt.err (!%p2129_p9)
}
  0x16   :  { %24 = dma.hbm_to_vmem [thread:$0]  %s2398_s0, 256, %s19_s21, [#allocation3], %s2181_s23, %s2181_s23, %s2182_s24  }
  0x17   :  { %s2183_s30 = smov [#allocation7]  }
  0x18   :  { %s44_s6 = sshll.u32 %s2183_s30, 4  ;;  %s45_s6 = int_to_ptr.vmem [resolvable:$true] %s44_s6 }
  0x19   :  { %s2141_s7 = scalar_lea.vmem %s45_s6, 512  ;;  %p2146_p11 = scmp.lt.s32.totalorder %s45_s6, %s45_s6 }
  0x1a   :  { %p2142_p10 = scmp.ne.s32.totalorder %s45_s6, %s2141_s7  ;;  %p2147_p12 = scmp.lt.s32.totalorder %s2141_s7, %s2141_s7 }
  0x1c   :  { %p2148_p13 = por %p2147_p12, %p2146_p11 }
  0x1e   :  { %p2149_p0 = pnand %p2148_p13, %p2142_p10 }
  0x20   :  { %2152 = shalt.err (!%p2149_p0)
}
  0x21   :  { %50 = dma.hbm_to_vmem [thread:$0]  %s2401_s3, 512, %s45_s6, [#allocation6], %s2181_s23, %s2181_s23, %s2182_s24  }
  0x22   :  { %2173 = dma.done.wait [#allocation3], 256  }
  0x23   :  { %2174 = vsyncadd [#allocation3], 4294967040 }
  0x24   :  { %2175 = dma.done.wait [#allocation6], 1024  }
  0x25   :  { %2176 = vsyncadd [#allocation6], 4294966272  ;;  %vm79_vm0 = vcmask 261120   ;;  %v67_v0 = vld [vmem:[#allocation5 + $0x18] sm:$0xff]  ;;  %v66_v1 = vld [vmem:[#allocation5 + $0x10] sm:$0xff]  ;;  %v2184_v6 = vmov 0.0  }
  0x26   :  { %1931 = vmatprep.subr.mxu0 %v67_v0  ;;  %v62_v2 = vld [vmem:[#allocation2] sm:$0xff]  ;;  %v65_v3 = vld [vmem:[#allocation5 + $0x8] sm:$0xff]  ;;  %v64_v4 = vld [vmem:[#allocation5] sm:$0xff]  ;;  %1942 = vmatprep.subr.mxu1 %v2184_v6  ;;  %vm2185_vm1 = vmmov 0   ;;  %s2186_s9 = smov 96   ;;  %vm164_vm2 = vcmask 64512  }
  0x27   :  { %1932 = vmatpush3.msra.mxu0 %v67_v0  ;;  %1939 = vmatprep.mubr.msk.f32.mxu0 %vm79_vm0, %v62_v2  ;;  %v63_v5 = vld [vmem:[#allocation2 + $0x8] sm:$0xff]  ;;  %v1845_v8 = vld [vmem:[%s2400_s2] ss:$0 sm:$0xff]  ;;  %s2187_s2 = smov 64   ;;  %s2188_s10 = smov 88  }
  0x28   :  { %1933 = vmatprep.subr.mxu0 %v66_v1  ;;  %1944 = vmatprep.mubr.msk.f32.mxu1 %vm2185_vm1, %v2184_v6  ;;  %s2189_s11 = smov 120   ;;  %s2190_s12 = smov 56  }
  0x29   :  { %1934 = vmatpush3.msra.mxu0 %v66_v1  ;;  %s2191_s13 = smov 112   ;;  %s2192_s14 = smov 80  }
  0x2a   :  { %1935 = vmatprep.subr.mxu0 %v65_v3  ;;  %s2193_s15 = smov 48   ;;  %s2194_s16 = smov 72  }
  0x2b   :  { %1936 = vmatpush3.msra.mxu0 %v65_v3  ;;  %v68_v3 = vld [vmem:[#allocation7] sm:$0xff]  ;;  %s2195_s17 = smov 104   ;;  %s2196_s18 = smov 40  }
  0x2c   :  { %1937 = vmatprep.subr.mxu0 %v64_v4  ;;  %s2197_s21 = smov [#allocation8]  }
  0x2d   :  { %1938 = vmatpush3.msra.mxu0 %v64_v4  ;;  %s1832_s22 = sshll.u32 %s2197_s21, 4  ;;  %s1833_s22 = int_to_ptr.vmem [resolvable:$true] %s1832_s22 }
  0x2e   :  { %1940 = vmatmul.mubr.msk.f32.vlgmr.msra.gmra.mxu0 %vm79_vm0, %v63_v5  ;;  %1952 = vmatprep.subr.mxu0 %v2184_v6  ;;  %s2153_s25 = scalar_lea.vmem %s1833_s22, 256  ;;  %p2158_p2 = scmp.lt.s32.totalorder %s1833_s22, %s1833_s22 }
  0x2f   :  { %1954 = vmatprep.mubr.msk.f32.mxu0 %vm2185_vm1, %v2184_v6  ;;  %p2154_p1 = scmp.ne.s32.totalorder %s1833_s22, %s2153_s25  ;;  %p2159_p3 = scmp.lt.s32.totalorder %s2153_s25, %s2153_s25 }
  0x31   :  { %p2160_p4 = por %p2159_p3, %p2158_p2 }
  0x33   :  { %p2161_p5 = pnand %p2160_p4, %p2154_p1 }
  0xee   :  { %v1941_v7 = vpop.f32.mrf.mxu0 }
  0xef   :  { %v2260_v11 = vadd.f32 %v1941_v7, %v1845_v8 }
  0xf0   :  { %v152_v9 = vpop.f32.mrf.mxu0 }
  0xf1   :  { %v2257_v10 = vadd.f32 %v1845_v8, %v152_v9 }
  0xf3   :  { %162 = vrot.lane.b32.xlu0 %v2257_v10, %s2186_s9 }
  0xf7   :  { %240 = vrot.lane.b32.xlu0 %v2260_v11, %s2186_s9 }
 0x165   :  { %v163_v12 = vpop.permute.xlu0 %162 }
 0x166   :  { %1943 = vmatpush3.xpose.msk.msra.mxu1 %vm164_vm2, %v163_v12 }
 0x167   :  { %1947 = vmatprep.subr.mxu1 %v2184_v6 }
 0x169   :  { %1945 = vmatmul.mubr.msk.f32.vlgmr.msra.gmra.mxu1 %vm164_vm2, %v2257_v10  ;;  %v241_v13 = vpop.permute.xlu0 %240 }
 0x16a   :  { %1948 = vmatpush3.xpose.msk.msra.mxu1 %vm164_vm2, %v241_v13  ;;  %1949 = vmatprep.mubr.msk.f32.mxu1 %vm2185_vm1, %v2184_v6 }
 0x16b   :  { %1957 = vmatprep.subr.mxu1 %v2184_v6 }
 0x16d   :  { %1950 = vmatmul.mubr.msk.f32.vlgmr.msra.gmra.mxu1 %vm164_vm2, %v2260_v11 }
 0x16e   :  { %1959 = vmatprep.mubr.msk.f32.mxu1 %vm2185_vm1, %v2184_v6 }
 0x229   :  { %v235_v14 = vpop.f32.mrf.mxu1 }
 0x22a   :  { %v316_v15 = vmul.f32 0.35355338, %v235_v14 }
 0x22b   :  { %v1946_v16 = vpop.f32.mrf.mxu1 }
 0x22c   :  { %v318_v17 = vsel %vm164_vm2, %v316_v15, -inf }
 0x22d   :  { %319 = vmax.xlane.f32.xlu1 %v318_v17  ;;  %v312_v18 = vpop.f32.mrf.mxu1  ;;  %v69_v17 = vld [vmem:[#allocation7 + $0x8] sm:$0xff] }
 0x22e   :  { %v317_v19 = vmul.f32 0.35355338, %v312_v18 }
 0x22f   :  { %v1951_v20 = vpop.f32.mrf.mxu1 }
 0x230   :  { %v321_v21 = vsel %vm164_vm2, %v317_v19, -inf }
 0x231   :  { %322 = vmax.xlane.f32.xlu1 %v321_v21 }
 0x242   :  { %340 = vrot.lane.b32.xlu1 %v2257_v10, %s2187_s2 }
 0x246   :  { %416 = vrot.lane.b32.xlu1 %v2260_v11, %s2187_s2 }
 0x24a   :  { %494 = vrot.lane.b32.xlu1 %v2257_v10, %s2188_s10 }
 0x24e   :  { %572 = vrot.lane.b32.xlu1 %v2260_v11, %s2188_s10 }
 0x2b6   :  { %v320_v22 = vpop.xlane.xlu1 %319 }
 0x2b7   :  { %v324_v23 = vsub.f32 %v316_v15, %v320_v22 }
 0x2b9   :  { %v326_v24 = vmul.f32 1.442695, %v324_v23 }
 0x2ba   :  { %v323_v25 = vpop.xlane.xlu1 %322 }
 0x2bb   :  { %2061 = vpow2.f32 %v326_v24  ;;  %v325_v26 = vsub.f32 %v317_v19, %v323_v25 }
 0x2bd   :  { %v328_v27 = vmul.f32 1.442695, %v325_v26 }
 0x2be   :  { %v341_v28 = vpop.permute.xlu1 %340 }
 0x2bf   :  { %2063 = vpow2.f32 %v328_v27  ;;  %1953 = vmatpush3.msra.mxu0 %v341_v28 }
 0x2c0   :  { %1962 = vmatprep.subr.mxu0 %v2184_v6 }
 0x2c2   :  { %v417_v29 = vpop.permute.xlu1 %416 }
 0x2c3   :  { %1958 = vmatpush3.msra.mxu1 %v417_v29 }
 0x2c4   :  { %1967 = vmatprep.subr.mxu1 %v2184_v6 }
 0x2c6   :  { %v495_v34 = vpop.permute.xlu1 %494 }
 0x2c8   :  { %v2062_v30 = vpop.eup %2061 }
 0x2c9   :  { %v330_v31 = vsel %vm164_vm2, %v2062_v30, 0.0 }
 0x2ca   :  { %331 = vadd.xlane.f32.xlu0 %v330_v31  ;;  %v573_v35 = vpop.permute.xlu1 %572 }
 0x2cc   :  { %v2064_v32 = vpop.eup %2063 }
 0x2cd   :  { %v333_v33 = vsel %vm164_vm2, %v2064_v32, 0.0 }
 0x2ce   :  { %334 = vadd.xlane.f32.xlu1 %v333_v33 }
 0x2df   :  { %570 = vrot.lane.b32.xlu1 %v2260_v11, %s2189_s11 }
 0x2e0   :  { %492 = vrot.lane.b32.xlu0 %v2257_v10, %s2189_s11 }
 0x353   :  { %v332_v36 = vpop.xlane.xlu0 %331 }
 0x354   :  { %2065 = vrcp.f32 %v332_v36 }
 0x357   :  { %v335_v37 = vpop.xlane.xlu1 %334  ;;  %v493_v42 = vpop.permute.xlu0 %492 }
 0x358   :  { %2067 = vrcp.f32 %v335_v37 }
 0x35b   :  { %v571_v43 = vpop.permute.xlu1 %570 }
 0x361   :  { %v2066_v38 = vpop.eup %2065 }
 0x362   :  { %v338_v39 = vmul.f32 %v2066_v38, %v2062_v30 }
 0x364   :  { %1955 = vmatmul.mubr.msk.f32.vlgmr.msra.gmra.mxu0 %vm164_vm2, %v338_v39 }
 0x365   :  { %v2068_v40 = vpop.eup %2067  ;;  %1963 = vmatpush3.xpose.msk.msra.mxu0 %vm164_vm2, %v495_v34  ;;  %1964 = vmatprep.mubr.msk.f32.mxu0 %vm2185_vm1, %v2184_v6 }
 0x366   :  { %v339_v41 = vmul.f32 %v2068_v40, %v2064_v32  ;;  %1972 = vmatprep.subr.mxu0 %v2184_v6 }
 0x368   :  { %1960 = vmatmul.mubr.msk.f32.vlgmr.msra.gmra.mxu1 %vm164_vm2, %v339_v41  ;;  %1965 = vmatmul.mubr.msk.f32.vlgmr.msra.gmra.mxu0 %vm164_vm2, %v493_v42 }
 0x369   :  { %1968 = vmatpush3.xpose.msk.msra.mxu1 %vm164_vm2, %v573_v35  ;;  %1969 = vmatprep.mubr.msk.f32.mxu1 %vm2185_vm1, %v2184_v6 }
 0x36a   :  { %1977 = vmatprep.subr.mxu1 %v2184_v6  ;;  %1974 = vmatprep.mubr.msk.f32.mxu0 %vm2185_vm1, %v2184_v6 }
 0x36c   :  { %1970 = vmatmul.mubr.msk.f32.vlgmr.msra.gmra.mxu1 %vm164_vm2, %v571_v43 }
 0x36d   :  { %1979 = vmatprep.mubr.msk.f32.mxu1 %vm2185_vm1, %v2184_v6 }
 0x424   :  { %v412_v44 = vpop.f32.mrf.mxu0 }
 0x426   :  { %v1956_v45 = vpop.f32.mrf.mxu0 }
 0x428   :  { %v488_v46 = vpop.f32.mrf.mxu1  ;;  %v566_v47 = vpop.f32.mrf.mxu0 }
 0x429   :  { %v648_v48 = vmul.f32 0.35355338, %v566_v47 }
 0x42a   :  { %v1961_v49 = vpop.f32.mrf.mxu1  ;;  %v1966_v50 = vpop.f32.mrf.mxu0 }
 0x42b   :  { %v650_v51 = vsel %vm164_vm2, %v648_v48, -inf }
 0x42c   :  { %v644_v52 = vpop.f32.mrf.mxu1  ;;  %651 = vmax.xlane.f32.xlu1 %v650_v51 }
 0x42d   :  { %v649_v53 = vmul.f32 0.35355338, %v644_v52 }
 0x42e   :  { %v1971_v54 = vpop.f32.mrf.mxu1 }
 0x42f   :  { %v653_v55 = vsel %vm164_vm2, %v649_v53, -inf }
 0x430   :  { %654 = vmax.xlane.f32.xlu0 %v653_v55  ;;  %v70_v55 = vld [vmem:[#allocation7 + $0x10] sm:$0xff] }
 0x446   :  { %748 = vrot.lane.b32.xlu0 %v2260_v11, %s2190_s12 }
 0x44a   :  { %986 = vrot.lane.b32.xlu0 %v2257_v10, %s2191_s13 }
 0x4b5   :  { %v652_v56 = vpop.xlane.xlu1 %651 }
 0x4b6   :  { %v656_v57 = vsub.f32 %v648_v48, %v652_v56 }
 0x4b8   :  { %v658_v58 = vmul.f32 1.442695, %v656_v57 }
 0x4b9   :  { %v655_v59 = vpop.xlane.xlu0 %654 }
 0x4ba   :  { %2069 = vpow2.f32 %v658_v58  ;;  %v657_v60 = vsub.f32 %v649_v53, %v655_v59 }
 0x4bc   :  { %v660_v61 = vmul.f32 1.442695, %v657_v60 }
 0x4bd   :  { %v749_v62 = vpop.permute.xlu0 %748 }
 0x4be   :  { %2071 = vpow2.f32 %v660_v61  ;;  %1978 = vmatpush3.msra.mxu1 %v749_v62 }
 0x4bf   :  { %1987 = vmatprep.subr.mxu1 %v68_v3 }
 0x4c1   :  { %v987_v22 = vpop.permute.xlu0 %986 }
 0x4c7   :  { %v2070_v63 = vpop.eup %2069 }
 0x4c8   :  { %v662_v0 = vsel %vm164_vm2, %v2070_v63, 0.0 }
 0x4c9   :  { %663 = vadd.xlane.f32.xlu1 %v662_v0 }
 0x4cb   :  { %v2072_v1 = vpop.eup %2071 }
 0x4cc   :  { %v665_v2 = vsel %vm164_vm2, %v2072_v1, 0.0 }
 0x4cd   :  { %666 = vadd.xlane.f32.xlu1 %v665_v2 }
 0x4de   :  { %672 = vrot.lane.b32.xlu1 %v2257_v10, %s2190_s12 }
 0x4e2   :  { %988 = vrot.lane.b32.xlu1 %v2257_v10, %s2192_s14 }
 0x4e6   :  { %1066 = vrot.lane.b32.xlu1 %v2260_v11, %s2192_s14 }
 0x4ea   :  { %1064 = vrot.lane.b32.xlu1 %v2260_v11, %s2191_s13 }
 0x552   :  { %v664_v4 = vpop.xlane.xlu1 %663 }
 0x553   :  { %2073 = vrcp.f32 %v664_v4 }
 0x556   :  { %v667_v5 = vpop.xlane.xlu1 %666 }
 0x557   :  { %2075 = vrcp.f32 %v667_v5 }
 0x55a   :  { %v673_v7 = vpop.permute.xlu1 %672 }
 0x55b   :  { %1973 = vmatpush3.msra.mxu0 %v673_v7 }
 0x55c   :  { %1982 = vmatprep.subr.mxu0 %v69_v17 }
 0x55e   :  { %v989_v12 = vpop.permute.xlu1 %988 }
 0x560   :  { %v2074_v8 = vpop.eup %2073 }
 0x561   :  { %v670_v9 = vmul.f32 %v2074_v8, %v2070_v63 }
 0x562   :  { %v1067_v15 = vpop.permute.xlu1 %1066 }
 0x563   :  { %1975 = vmatmul.mubr.msk.f32.vlgmr.msra.gmra.mxu0 %vm164_vm2, %v670_v9 }
 0x564   :  { %v2076_v13 = vpop.eup %2075  ;;  %1983 = vmatpush3.msra.mxu0 %v69_v17 }
 0x565   :  { %v671_v14 = vmul.f32 %v2076_v13, %v2072_v1  ;;  %1992 = vmatprep.subr.mxu0 %v2184_v6 }
 0x566   :  { %v1065_v16 = vpop.permute.xlu1 %1064 }
 0x567   :  { %1980 = vmatmul.mubr.msk.f32.vlgmr.msra.gmra.mxu1 %vm164_vm2, %v671_v14 }
 0x568   :  { %1989 = vmatprep.mubr.msk.f32.mxu1 %vm164_vm2, %v412_v44  ;;  %1988 = vmatpush3.msra.mxu1 %v68_v3 }
 0x569   :  { %1997 = vmatprep.subr.mxu1 %v2184_v6 }
 0x56b   :  { %1990 = vmatmul.mubr.msk.f32.vlgmr.msra.gmra.mxu1 %vm164_vm2, %v488_v46 }
 0x56c   :  { %1998 = vmatpush3.xpose.msk.msra.mxu1 %vm164_vm2, %v1067_v15  ;;  %1999 = vmatprep.mubr.msk.f32.mxu1 %vm2185_vm1, %v2184_v6 }
 0x56d   :  { %2007 = vmatprep.subr.mxu1 %v2184_v6 }
 0x56f   :  { %2000 = vmatmul.mubr.msk.f32.vlgmr.msra.gmra.mxu1 %vm164_vm2, %v1065_v16 }
 0x570   :  { %2009 = vmatprep.mubr.msk.f32.mxu1 %vm2185_vm1, %v2184_v6 }
 0x623   :  { %v744_v18 = vpop.f32.mrf.mxu0 }
 0x624   :  { %1984 = vmatprep.mubr.msk.f32.mxu0 %vm164_vm2, %v744_v18 }
 0x625   :  { %v1976_v19 = vpop.f32.mrf.mxu0 }
 0x627   :  { %v820_v20 = vpop.f32.mrf.mxu1 }
 0x628   :  { %1985 = vmatmul.mubr.msk.f32.vlgmr.msra.gmra.mxu0 %vm164_vm2, %v820_v20 }
 0x629   :  { %1993 = vmatpush3.xpose.msk.msra.mxu0 %vm164_vm2, %v989_v12  ;;  %v1981_v21 = vpop.f32.mrf.mxu1  ;;  %1994 = vmatprep.mubr.msk.f32.mxu0 %vm2185_vm1, %v2184_v6 }
 0x62a   :  { %2002 = vmatprep.subr.mxu0 %v2184_v6 }
 0x62b   :  { %v2332_v23 = vpop.f32.mrf.mxu1 }
 0x62c   :  { %1995 = vmatmul.mubr.msk.f32.vlgmr.msra.gmra.mxu0 %vm164_vm2, %v987_v22 }
 0x62d   :  { %v2335_v24 = vpop.f32.mrf.mxu1  ;;  %2004 = vmatprep.mubr.msk.f32.mxu0 %vm2185_vm1, %v2184_v6 }
 0x62f   :  { %v1138_v25 = vpop.f32.mrf.mxu1 }
 0x630   :  { %v1143_v26 = vmul.f32 0.35355338, %v1138_v25 }
 0x631   :  { %v2001_v27 = vpop.f32.mrf.mxu1 }
 0x632   :  { %v1147_v28 = vsel %vm164_vm2, %v1143_v26, -inf }
 0x633   :  { %1148 = vmax.xlane.f32.xlu1 %v1147_v28  ;;  %v71_v28 = vld [vmem:[#allocation7 + $0x18] sm:$0xff] }
 0x644   :  { %1166 = vrot.lane.b32.xlu1 %v2257_v10, %s2193_s15 }
 0x648   :  { %1403 = vrot.lane.b32.xlu1 %v2257_v10, %s2194_s16 }
 0x64c   :  { %1481 = vrot.lane.b32.xlu1 %v2260_v11, %s2194_s16 }
 0x650   :  { %1479 = vrot.lane.b32.xlu1 %v2260_v11, %s2195_s17 }
 0x6bc   :  { %v1149_v29 = vpop.xlane.xlu1 %1148 }
 0x6bd   :  { %v1151_v31 = vsub.f32 %v1143_v26, %v1149_v29 }
 0x6bf   :  { %v1154_v32 = vmul.f32 1.442695, %v1151_v31 }
 0x6c0   :  { %v1167_v30 = vpop.permute.xlu1 %1166 }
 0x6c1   :  { %2003 = vmatpush3.msra.mxu0 %v1167_v30  ;;  %2077 = vpow2.f32 %v1154_v32 }
 0x6c2   :  { %2012 = vmatprep.subr.mxu0 %v70_v55 }
 0x6c4   :  { %v1404_v51 = vpop.permute.xlu1 %1403 }
 0x6c8   :  { %v1482_v62 = vpop.permute.xlu1 %1481 }
 0x6cc   :  { %v1480_v1 = vpop.permute.xlu1 %1479 }
 0x6ce   :  { %v2078_v39 = vpop.eup %2077 }
 0x6cf   :  { %v1159_v40 = vsel %vm164_vm2, %v2078_v39, 0.0 }
 0x6e8   :  { %v2344_v33 = vpop.f32.mrf.mxu0 }
 0x6e9   :  { %v983_v8 = vadd.f32 %v2332_v23, %v2344_v33 }
 0x6ea   :  { %v2346_v34 = vpop.f32.mrf.mxu0 }
 0x6eb   :  { %v978_v12 = vadd.f32 %v2335_v24, %v2346_v34 }
 0x6ec   :  { %v1060_v35 = vpop.f32.mrf.mxu0 }
 0x6ed   :  { %v1142_v36 = vmul.f32 0.35355338, %v1060_v35 }
 0x6ee   :  { %v1996_v37 = vpop.f32.mrf.mxu0 }
 0x6ef   :  { %v1144_v38 = vsel %vm164_vm2, %v1142_v36, -inf }
 0x6f0   :  { %1145 = vmax.xlane.f32.xlu0 %v1144_v38 }
 0x6f4   :  { %1160 = vadd.xlane.f32.xlu0 %v1159_v40 }
 0x779   :  { %v1146_v41 = vpop.xlane.xlu0 %1145 }
 0x77a   :  { %v1150_v42 = vsub.f32 %v1142_v36, %v1146_v41  ;;  %v1880_v36 = vld [vmem:[%s2402_s4] ss:$0 sm:$0xff] }
 0x77c   :  { %v1152_v43 = vmul.f32 1.442695, %v1150_v42 }
 0x77d   :  { %v1161_v46 = vpop.xlane.xlu0 %1160 }
 0x77e   :  { %2079 = vpow2.f32 %v1152_v43 }
 0x77f   :  { %2081 = vrcp.f32 %v1161_v46 }
 0x78b   :  { %v2080_v44 = vpop.eup %2079 }
 0x78c   :  { %v1156_v45 = vsel %vm164_vm2, %v2080_v44, 0.0  ;;  %v2082_v48 = vpop.eup %2081 }
 0x78d   :  { %1157 = vadd.xlane.f32.xlu0 %v1156_v45  ;;  %v1165_v50 = vmul.f32 %v2082_v48, %v2078_v39 }
 0x7a3   :  { %1242 = vrot.lane.b32.xlu0 %v2260_v11, %s2193_s15 }
 0x7a7   :  { %1401 = vrot.lane.b32.xlu0 %v2257_v10, %s2195_s17 }
 0x816   :  { %v1158_v47 = vpop.xlane.xlu0 %1157 }
 0x817   :  { %2083 = vrcp.f32 %v1158_v47 }
 0x81a   :  { %v1243_v49 = vpop.permute.xlu0 %1242 }
 0x81b   :  { %2008 = vmatpush3.msra.mxu1 %v1243_v49 }
 0x81c   :  { %2010 = vmatmul.mubr.msk.f32.vlgmr.msra.gmra.mxu1 %vm164_vm2, %v1165_v50  ;;  %2017 = vmatprep.subr.mxu1 %v2184_v6 }
 0x81d   :  { %2018 = vmatpush3.xpose.msk.msra.mxu1 %vm164_vm2, %v1404_v51  ;;  %2019 = vmatprep.mubr.msk.f32.mxu1 %vm2185_vm1, %v2184_v6 }
 0x81e   :  { %v1402_v52 = vpop.permute.xlu0 %1401  ;;  %2027 = vmatprep.subr.mxu1 %v2184_v6 }
 0x820   :  { %2020 = vmatmul.mubr.msk.f32.vlgmr.msra.gmra.mxu1 %vm164_vm2, %v1402_v52 }
 0x821   :  { %2029 = vmatprep.mubr.msk.f32.mxu1 %vm2185_vm1, %v2184_v6 }
 0x824   :  { %v2084_v53 = vpop.eup %2083 }
 0x825   :  { %v1164_v54 = vmul.f32 %v2084_v53, %v2080_v44 }
 0x827   :  { %2005 = vmatmul.mubr.msk.f32.vlgmr.msra.gmra.mxu0 %vm164_vm2, %v1164_v54 }
 0x828   :  { %2013 = vmatpush3.msra.mxu0 %v70_v55 }
 0x829   :  { %2022 = vmatprep.subr.mxu0 %v2184_v6 }
 0x8dc   :  { %v1314_v56 = vpop.f32.mrf.mxu1 }
 0x8de   :  { %v2011_v57 = vpop.f32.mrf.mxu1 }
 0x8e0   :  { %v1475_v58 = vpop.f32.mrf.mxu1 }
 0x8e1   :  { %v1557_v59 = vmul.f32 0.35355338, %v1475_v58 }
 0x8e2   :  { %v2021_v60 = vpop.f32.mrf.mxu1 }
 0x8e3   :  { %v1559_v61 = vsel %vm164_vm2, %v1557_v59, -inf }
 0x8e4   :  { %1560 = vmax.xlane.f32.xlu0 %v1559_v61 }
 0x8e7   :  { %v1238_v63 = vpop.f32.mrf.mxu0 }
 0x8e8   :  { %2014 = vmatprep.mubr.msk.f32.mxu0 %vm164_vm2, %v1238_v63 }
 0x8e9   :  { %v2006_v0 = vpop.f32.mrf.mxu0  ;;  %2015 = vmatmul.mubr.msk.f32.vlgmr.msra.gmra.mxu0 %vm164_vm2, %v1314_v56 }
 0x8ea   :  { %2023 = vmatpush3.xpose.msk.msra.mxu0 %vm164_vm2, %v1482_v62  ;;  %2024 = vmatprep.mubr.msk.f32.mxu0 %vm2185_vm1, %v2184_v6 }
 0x8eb   :  { %2032 = vmatprep.subr.mxu0 %v2184_v6 }
 0x8ed   :  { %2025 = vmatmul.mubr.msk.f32.vlgmr.msra.gmra.mxu0 %vm164_vm2, %v1480_v1 }
 0x8ee   :  { %2034 = vmatprep.mubr.msk.f32.mxu0 %vm2185_vm1, %v2184_v6 }
 0x96d   :  { %v1561_v2 = vpop.xlane.xlu0 %1560 }
 0x96e   :  { %v1565_v3 = vsub.f32 %v1557_v59, %v1561_v2 }
 0x970   :  { %v1567_v4 = vmul.f32 1.442695, %v1565_v3 }
 0x972   :  { %2085 = vpow2.f32 %v1567_v4 }
 0x97f   :  { %v2086_v5 = vpop.eup %2085 }
 0x980   :  { %v1571_v7 = vsel %vm164_vm2, %v2086_v5, 0.0 }
 0x981   :  { %1572 = vadd.xlane.f32.xlu0 %v1571_v7 }
 0x9a9   :  { %v2016_v9 = vpop.f32.mrf.mxu0 }
 0x9aa   :  { %v1400_v13 = vadd.f32 %v2016_v9, %v983_v8 }
 0x9ab   :  { %v1390_v14 = vpop.f32.mrf.mxu0 }
 0x9ac   :  { %v1399_v15 = vadd.f32 %v1390_v14, %v978_v12 }
 0x9ad   :  { %v1553_v16 = vpop.f32.mrf.mxu0 }
 0x9ae   :  { %v1558_v6 = vmul.f32 0.35355338, %v1553_v16 }
 0x9af   :  { %v2026_v17 = vpop.f32.mrf.mxu0 }
 0x9b0   :  { %v1562_v18 = vsel %vm164_vm2, %v1558_v6, -inf }
 0x9b1   :  { %1563 = vmax.xlane.f32.xlu1 %v1562_v18 }
 0x9c2   :  { %1581 = vrot.lane.b32.xlu1 %v2257_v10, %s2196_s18 }
 0xa0a   :  { %v1573_v19 = vpop.xlane.xlu0 %1572 }
 0xa0b   :  { %2087 = vrcp.f32 %v1573_v19 }
 0xa18   :  { %v2088_v21 = vpop.eup %2087 }
 0xa19   :  { %v1579_v24 = vmul.f32 %v2088_v21, %v2086_v5 }
 0xa3a   :  { %v1564_v20 = vpop.xlane.xlu1 %1563 }
 0xa3b   :  { %v1566_v22 = vsub.f32 %v1558_v6, %v1564_v20 }
 0xa3d   :  { %v1569_v23 = vmul.f32 1.442695, %v1566_v22 }
 0xa3e   :  { %v1582_v25 = vpop.permute.xlu1 %1581 }
 0xa3f   :  { %2089 = vpow2.f32 %v1569_v23  ;;  %2028 = vmatpush3.msra.mxu1 %v1582_v25 }
 0xa40   :  { %2030 = vmatmul.mubr.msk.f32.vlgmr.msra.gmra.mxu1 %vm164_vm2, %v1579_v24  ;;  %2037 = vmatprep.subr.mxu1 %v71_v28 }
 0xa41   :  { %2038 = vmatpush3.msra.mxu1 %v71_v28 }
 0xa4c   :  { %v2090_v26 = vpop.eup %2089 }
 0xa4d   :  { %v1574_v27 = vsel %vm164_vm2, %v2090_v26, 0.0 }
 0xa4e   :  { %1575 = vadd.xlane.f32.xlu0 %v1574_v27 }
 0xa64   :  { %1657 = vrot.lane.b32.xlu0 %v2260_v11, %s2196_s18 }
 0xad7   :  { %v1576_v10 = vpop.xlane.xlu0 %1575 }
 0xad8   :  { %2091 = vrcp.f32 %v1576_v10 }
 0xadb   :  { %v1658_v29 = vpop.permute.xlu0 %1657 }
 0xadc   :  { %2033 = vmatpush3.msra.mxu0 %v1658_v29 }
 0xae5   :  { %v2092_v30 = vpop.eup %2091 }
 0xae6   :  { %v1580_v31 = vmul.f32 %v2092_v30, %v2090_v26 }
 0xae8   :  { %2035 = vmatmul.mubr.msk.f32.vlgmr.msra.gmra.mxu0 %vm164_vm2, %v1580_v31 }
 0xb00   :  { %v1653_v32 = vpop.f32.mrf.mxu1 }
 0xb01   :  { %2039 = vmatprep.mubr.msk.f32.mxu1 %vm164_vm2, %v1653_v32 }
 0xb02   :  { %v2031_v33 = vpop.f32.mrf.mxu1 }
 0xba8   :  { %v1729_v34 = vpop.f32.mrf.mxu0 }
 0xba9   :  { %2040 = vmatmul.mubr.msk.f32.vlgmr.msra.gmra.mxu1 %vm164_vm2, %v1729_v34 }
 0xbaa   :  { %v2036_v35 = vpop.f32.mrf.mxu0 }
 0xc69   :  { %v2041_v11 = vpop.f32.mrf.mxu1 }
 0xc6a   :  { %v1815_v37 = vadd.f32 %v2041_v11, %v1400_v13 }
 0xc6b   :  { %v1805_v38 = vpop.f32.mrf.mxu1 }
 0xc6c   :  { %v1824_v39 = vadd.f32 %v1880_v36, %v1815_v37  ;;  %v1814_v40 = vadd.f32 %v1805_v38, %v1399_v15 }
 0xc6e   :  { %1826 = vst.msk [vmem:[#allocation8 + $0x8] sm:$0xff] %vm79_vm0, %v1824_v39  ;;  %v1823_v41 = vadd.f32 %v1880_v36, %v1814_v40 }
 0xc70   :  { %1825 = vst.msk [vmem:[#allocation8] sm:$0xff] %vm79_vm0, %v1823_v41 }
 0xc71   :  { %2164 = shalt.err (!%p2161_p5)
}
 0xc72   :  { %1838 = dma.vmem_to_hbm [thread:$0]  %s1833_s22, 256, %s2403_s5, [#allocation4], %s2181_s23, %s2181_s23, %s2182_s24  }
 0xc73   :  { %2177 = dma.done.wait [#allocation4], 256  }
 0xc74   :  { %2178 = vsyncadd [#allocation4], 4294967040 }
 0xc75   :  { %1842 = vsyncpa [#allocation3], 1 }
 0xc76   :  { %1843 = vsyncpa [#allocation6], 1 }
 0xc77   :  { %1844 = vsyncpa [#allocation4], 1 }

</bundles_post_ra>
